<compile_context>
chip_gen: v7x
topology: tpu7x:2x2x1
jax: 0.10.0
libtpu: 0.0.40
codegen_flags: <defaults>
</compile_context>

<pallas_src>
import functools

import jax
import jax.numpy as jnp
from jax.experimental import pallas as pl
from jax.experimental.pallas import tpu as pltpu

_LANE = 128
_NEG_BIG = -1e30  # "minus infinity" bias for padded logit columns (finite -> no NaNs)


def _round_up(x, m):
    return (x + m - 1) // m * m


def _cdiv(a, b):
    return (a + b - 1) // b


# ---------------------------------------------------------------------------
# Kernel: one (tile_n, in) slab of rows -> full 4-layer MLP + log_softmax.
# Weights are already (in_k, out_k) so the MXU consumes them directly.
# Only the first `out_real` logit columns are written back to HBM.
# ---------------------------------------------------------------------------
def mlp_kernel(out_real,
               x_ref,
               w1_ref, b1_ref,
               w2_ref, b2_ref,
               w3_ref, b3_ref,
               w4_ref, b4_ref,
               o_ref):
    x = x_ref[...].astype(jnp.float32)            # emulate .to(float32) in-kernel
    h = jnp.maximum(
        jnp.dot(x, w1_ref[...], preferred_element_type=jnp.float32)
        + b1_ref[...], 0.0)
    h = jnp.maximum(
        jnp.dot(h, w2_ref[...], preferred_element_type=jnp.float32)
        + b2_ref[...], 0.0)
    h = jnp.maximum(
        jnp.dot(h, w3_ref[...], preferred_element_type=jnp.float32)
        + b3_ref[...], 0.0)
    logits = (jnp.dot(h, w4_ref[...], preferred_element_type=jnp.float32)
              + b4_ref[...])                      # (tile_n, out_pad); pad cols ~ -1e30

    # Numerically stable log_softmax along the feature (lane) axis.  The padded
    # columns carry ~-1e30, so exp(shifted) == 0 there and they never perturb
    # the normalization of the real columns.
    m = jnp.max(logits, axis=1, keepdims=True)
    shifted = logits - m
    lse = jnp.log(jnp.sum(jnp.exp(shifted), axis=1, keepdims=True))
    # Store only the real columns (narrow output => far less HBM writeback).
    o_ref[...] = (shifted - lse)[:, :out_real]


# ---------------------------------------------------------------------------
# One-time parameter preparation (PyTorch (out,in) -> (in,out), fp32 cast,
# lane-pad of the final layer).  Do NOT call this per forward pass.
# ---------------------------------------------------------------------------
def prepare_params(params):
    out_nums = params["w4"].shape[0]
    out_pad = _round_up(max(out_nums, _LANE), _LANE)
    prepped = []
    for i in (1, 2, 3, 4):
        w = jnp.asarray(params[f"w{i}"], jnp.float32).T          # (in_k, out_k)
        b = jnp.asarray(params[f"b{i}"], jnp.float32).reshape(1, -1)
        if i == 4 and out_pad != out_nums:
            w = jnp.pad(w, ((0, 0), (0, out_pad - out_nums)))                 # zeros
            b = jnp.pad(b, ((0, 0), (0, out_pad - out_nums)),
                        constant_values=_NEG_BIG)                             # -inf-ish
        prepped.extend([w, b])
    return tuple(prepped), out_nums


# ---------------------------------------------------------------------------
# Forward pass (jitted): reshape input, tile the batch over a parallel grid,
# run the kernel.  Tiny batches fall back to a fused XLA forward.
# ---------------------------------------------------------------------------
@functools.partial(jax.jit,
                   static_argnames=("out_nums", "tile_n", "xla_fallback_rows"))
def net_forward(x, prepped, out_nums, *, tile_n=1024, xla_fallback_rows=64):
    in_nums = prepped[0].shape[0]
    mid_nums = prepped[2].shape[0]
    out_pad = prepped[-1].shape[1]

    # emulate x.view(-1, in_nums); the f32 cast happens inside the kernel.
    x2d = x.reshape(-1, in_nums)
    n = x2d.shape[0]

    # Tiny batches: fixed pallas_call cost + weight DMA dominates; fused XLA wins.
    if n < xla_fallback_rows:
        h = x2d.astype(jnp.float32)
        for i in range(3):
            h = jnp.maximum(h @ prepped[2 * i] + prepped[2 * i + 1], 0.0)
        logits = h @ prepped[6] + prepped[7]
        return jax.nn.log_softmax(logits, axis=1)[:, :out_nums]

    # --- adaptive batch tiling -------------------------------------------------
    n8 = _round_up(n, 8)
    num_tiles = _cdiv(n8, tile_n)
    if num_tiles == 1 and n8 >= 16:
        num_tiles = 2                       # v7x megacore: use both TensorCores
    tn = _round_up(_cdiv(n8, num_tiles), 8)  # minimal padding for ragged N
    n_pad = num_tiles * tn
    if n_pad != n:
        x2d = jnp.pad(x2d, ((0, n_pad - n), (0, 0)))

    # BlockSpecs: x/out tiled over the grid, weights/biases full-array & resident.
    x_spec = pl.BlockSpec((tn, in_nums), lambda i: (i, 0))
    weight_specs = [pl.BlockSpec(a.shape, lambda i: (0, 0)) for a in prepped]
    out_spec = pl.BlockSpec((tn, out_nums), lambda i: (i, 0))

    # Explicit VMEM budget: x/out tiles double-buffered by the pipeline, weights
    # counted with the default buffer count (2), plus fp32-intermediate headroom.
    itemsize = jnp.dtype(x2d.dtype).itemsize
    weight_bytes = sum(int(a.size) * 4 for a in prepped)
    x_tile_bytes = tn * in_nums * itemsize
    out_tile_bytes = tn * out_nums * 4
    interm_bytes = 4 * tn * max(mid_nums, out_pad) * 4
    needed = (2 * (x_tile_bytes + out_tile_bytes)
              + 2 * weight_bytes
              + interm_bytes + (1 << 20))
    vmem_limit = int(min(64 * 1024 * 1024, max(8 * 1024 * 1024, needed)))

    # Advisory cost estimate so XLA schedules the custom call sensibly.
    flops = 2 * n_pad * (in_nums * mid_nums
                         + 2 * mid_nums * mid_nums
                         + mid_nums * out_pad)
    cost = pl.CostEstimate(
        flops=flops,
        transcendentals=n_pad * (out_pad + 1),            # exp per col + log per row
        bytes_accessed=(n_pad * in_nums * itemsize
                        + n_pad * out_nums * 4
                        + weight_bytes),
    )

    out = pl.pallas_call(
        functools.partial(mlp_kernel, out_nums),
        out_shape=jax.ShapeDtypeStruct((n_pad, out_nums), jnp.float32),
        grid=(num_tiles,),
        in_specs=[x_spec] + weight_specs,
        out_specs=out_spec,
        compiler_params=pltpu.CompilerParams(
            dimension_semantics=("parallel",),
            vmem_limit_bytes=vmem_limit,
        ),
        cost_estimate=cost,
    )(x2d, *prepped)

    return out[:n] if n_pad != n else out


# ---------------------------------------------------------------------------
# Deterministic Linear-layer init (PyTorch-like uniform fan_in bound).
# ---------------------------------------------------------------------------
def init_params(key, in_nums, mid_nums, out_nums):
    dims = [(in_nums, mid_nums), (mid_nums, mid_nums),
            (mid_nums, mid_nums), (mid_nums, out_nums)]
    params = {}
    for i, (fan_in, fan_out) in enumerate(dims, start=1):
        key, kw, kb = jax.random.split(key, 3)
        bound = 1.0 / jnp.sqrt(fan_in)
        params[f"w{i}"] = jax.random.uniform(kw, (fan_out, fan_in),
                                             jnp.float32, -bound, bound)
        params[f"b{i}"] = jax.random.uniform(kb, (fan_out,),
                                             jnp.float32, -bound, bound)
    return params


if __name__ == "__main__":
    in_nums, mid_nums, out_nums = 32, 64, 16
    key = jax.random.PRNGKey(0)
    key, kx_small, kx_big = jax.random.split(key, 3)

    params = init_params(key, in_nums, mid_nums, out_nums)
    prepped, out_real = prepare_params(params)   # one-time transpose/cast/pad

    # Pure-JAX reference of the PyTorch forward pass.
    def ref_forward(x):
        h = x.reshape(-1, in_nums).astype(jnp.float32)
        for i in (1, 2, 3):
            h = jnp.maximum(h @ params[f"w{i}"].T + params[f"b{i}"], 0.0)
        logits = h @ params["w4"].T + params["b4"]
        return jax.nn.log_softmax(logits, axis=1)

    # --- 1) Pallas path: 256 flattened rows -> grid of 2 tiles (128 rows each) ---
    x_big = jax.random.normal(kx_big, (8, 32, in_nums), dtype=jnp.float32)
    y_big = net_forward(x_big, prepped, out_nums=out_real)
    jax.block_until_ready(y_big)
    assert y_big.shape == (256, out_real), y_big.shape
    err_big = float(jnp.max(jnp.abs(y_big - ref_forward(x_big))))
    assert err_big < 2e-3, err_big
    assert float(jnp.max(jnp.abs(
        jax.scipy.special.logsumexp(y_big, axis=1)))) < 1e-4

    # --- 2) Tiny batch (2, 4, 32) -> 8 rows: fused-XLA fallback path -------------
    x_small = jax.random.normal(kx_small, (2, 4, in_nums), dtype=jnp.float32)
    y_small = net_forward(x_small, prepped, out_nums=out_real)
    jax.block_until_ready(y_small)
    assert y_small.shape == (8, out_real), y_small.shape
    err_small = float(jnp.max(jnp.abs(y_small - ref_forward(x_small))))
    assert err_small < 2e-3, err_small

    print("KERNEL_OK")
</pallas_src>

<mosaic_0001>
module attributes {stable_mosaic.version = 11 : i64} {
  func.func @mlp_kernel(%arg0: i32, %arg1: memref<128x32xf32, #tpu.memory_space<vmem>>, %arg2: memref<32x64xf32, #tpu.memory_space<vmem>>, %arg3: memref<1x64xf32, #tpu.memory_space<vmem>>, %arg4: memref<64x64xf32, #tpu.memory_space<vmem>>, %arg5: memref<1x64xf32, #tpu.memory_space<vmem>>, %arg6: memref<64x64xf32, #tpu.memory_space<vmem>>, %arg7: memref<1x64xf32, #tpu.memory_space<vmem>>, %arg8: memref<64x128xf32, #tpu.memory_space<vmem>>, %arg9: memref<1x128xf32, #tpu.memory_space<vmem>>, %arg10: memref<128x16xf32, #tpu.memory_space<vmem>>) attributes {dimension_semantics = [#tpu.dimension_semantics<parallel>], iteration_bounds = array<i64: 2>, scalar_prefetch = 0 : i64, scratch_operands = 0 : i64, tpu.core_type = #tpu.core_type<tc>, window_params = [{transform_indices = @transform_0, window_bounds = array<i64: 128, 32>}, {pipeline_mode = #tpu.pipeline_mode<synchronous>, transform_indices = @transform_1, window_bounds = array<i64: 32, 64>}, {pipeline_mode = #tpu.pipeline_mode<synchronous>, transform_indices = @transform_2, window_bounds = array<i64: 1, 64>}, {pipeline_mode = #tpu.pipeline_mode<synchronous>, transform_indices = @transform_3, window_bounds = array<i64: 64, 64>}, {pipeline_mode = #tpu.pipeline_mode<synchronous>, transform_indices = @transform_4, window_bounds = array<i64: 1, 64>}, {pipeline_mode = #tpu.pipeline_mode<synchronous>, transform_indices = @transform_5, window_bounds = array<i64: 64, 64>}, {pipeline_mode = #tpu.pipeline_mode<synchronous>, transform_indices = @transform_6, window_bounds = array<i64: 1, 64>}, {pipeline_mode = #tpu.pipeline_mode<synchronous>, transform_indices = @transform_7, window_bounds = array<i64: 64, 128>}, {pipeline_mode = #tpu.pipeline_mode<synchronous>, transform_indices = @transform_8, window_bounds = array<i64: 1, 128>}, {transform_indices = @transform_9, window_bounds = array<i64: 128, 16>}]} {
    %c0 = arith.constant 0 : index
    %c0_0 = arith.constant 0 : index
    %0 = vector.load %arg1[%c0, %c0_0] : memref<128x32xf32, #tpu.memory_space<vmem>>, vector<128x32xf32>
    %c0_1 = arith.constant 0 : index
    %c0_2 = arith.constant 0 : index
    %1 = vector.load %arg2[%c0_1, %c0_2] : memref<32x64xf32, #tpu.memory_space<vmem>>, vector<32x64xf32>
    %cst = arith.constant dense<0.000000e+00> : vector<128x64xf32>
    %2 = tpu.matmul %0, %1, %cst {dimension_numbers = #tpu.dot_dimension_numbers<[1], [0], [0], [1], [0, 0, 1, 1], [], []>} : vector<128x32xf32>, vector<32x64xf32>, vector<128x64xf32> -> vector<128x64xf32>
    %c0_3 = arith.constant 0 : index
    %c0_4 = arith.constant 0 : index
    %3 = vector.load %arg3[%c0_3, %c0_4] : memref<1x64xf32, #tpu.memory_space<vmem>>, vector<1x64xf32>
    %4 = vector.broadcast %3 : vector<1x64xf32> to vector<128x64xf32>
    %5 = arith.addf %2, %4 : vector<128x64xf32>
    %cst_5 = arith.constant 0.000000e+00 : f32
    %6 = vector.broadcast %cst_5 : f32 to vector<128x64xf32>
    %7 = arith.maximumf %5, %6 : vector<128x64xf32>
    %c0_6 = arith.constant 0 : index
    %c0_7 = arith.constant 0 : index
    %8 = vector.load %arg4[%c0_6, %c0_7] : memref<64x64xf32, #tpu.memory_space<vmem>>, vector<64x64xf32>
    %cst_8 = arith.constant dense<0.000000e+00> : vector<128x64xf32>
    %9 = tpu.matmul %7, %8, %cst_8 {dimension_numbers = #tpu.dot_dimension_numbers<[1], [0], [0], [1], [0, 0, 1, 1], [], []>} : vector<128x64xf32>, vector<64x64xf32>, vector<128x64xf32> -> vector<128x64xf32>
    %c0_9 = arith.constant 0 : index
    %c0_10 = arith.constant 0 : index
    %10 = vector.load %arg5[%c0_9, %c0_10] : memref<1x64xf32, #tpu.memory_space<vmem>>, vector<1x64xf32>
    %11 = vector.broadcast %10 : vector<1x64xf32> to vector<128x64xf32>
    %12 = arith.addf %9, %11 : vector<128x64xf32>
    %cst_11 = arith.constant 0.000000e+00 : f32
    %13 = vector.broadcast %cst_11 : f32 to vector<128x64xf32>
    %14 = arith.maximumf %12, %13 : vector<128x64xf32>
    %c0_12 = arith.constant 0 : index
    %c0_13 = arith.constant 0 : index
    %15 = vector.load %arg6[%c0_12, %c0_13] : memref<64x64xf32, #tpu.memory_space<vmem>>, vector<64x64xf32>
    %cst_14 = arith.constant dense<0.000000e+00> : vector<128x64xf32>
    %16 = tpu.matmul %14, %15, %cst_14 {dimension_numbers = #tpu.dot_dimension_numbers<[1], [0], [0], [1], [0, 0, 1, 1], [], []>} : vector<128x64xf32>, vector<64x64xf32>, vector<128x64xf32> -> vector<128x64xf32>
    %c0_15 = arith.constant 0 : index
    %c0_16 = arith.constant 0 : index
    %17 = vector.load %arg7[%c0_15, %c0_16] : memref<1x64xf32, #tpu.memory_space<vmem>>, vector<1x64xf32>
    %18 = vector.broadcast %17 : vector<1x64xf32> to vector<128x64xf32>
    %19 = arith.addf %16, %18 : vector<128x64xf32>
    %cst_17 = arith.constant 0.000000e+00 : f32
    %20 = vector.broadcast %cst_17 : f32 to vector<128x64xf32>
    %21 = arith.maximumf %19, %20 : vector<128x64xf32>
    %c0_18 = arith.constant 0 : index
    %c0_19 = arith.constant 0 : index
    %22 = vector.load %arg8[%c0_18, %c0_19] : memref<64x128xf32, #tpu.memory_space<vmem>>, vector<64x128xf32>
    %cst_20 = arith.constant dense<0.000000e+00> : vector<128x128xf32>
    %23 = tpu.matmul %21, %22, %cst_20 {dimension_numbers = #tpu.dot_dimension_numbers<[1], [0], [0], [1], [0, 0, 1, 1], [], []>} : vector<128x64xf32>, vector<64x128xf32>, vector<128x128xf32> -> vector<128x128xf32>
    %c0_21 = arith.constant 0 : index
    %c0_22 = arith.constant 0 : index
    %24 = vector.load %arg9[%c0_21, %c0_22] : memref<1x128xf32, #tpu.memory_space<vmem>>, vector<1x128xf32>
    %25 = vector.broadcast %24 : vector<1x128xf32> to vector<128x128xf32>
    %26 = arith.addf %23, %25 : vector<128x128xf32>
    %cst_23 = arith.constant dense<0xFF800000> : vector<128xf32>
    %27 = vector.multi_reduction <maximumf>, %26, %cst_23 [1] : vector<128x128xf32> to vector<128xf32>
    %28 = vector.shape_cast %27 : vector<128xf32> to vector<128x1xf32>
    %29 = vector.broadcast %28 : vector<128x1xf32> to vector<128x128xf32>
    %30 = arith.subf %26, %29 : vector<128x128xf32>
    %31 = math.exp %30 : vector<128x128xf32>
    %cst_24 = arith.constant dense<0.000000e+00> : vector<128xf32>
    %32 = vector.multi_reduction <add>, %31, %cst_24 [1] : vector<128x128xf32> to vector<128xf32>
    %33 = vector.shape_cast %32 : vector<128xf32> to vector<128x1xf32>
    %34 = math.log %33 : vector<128x1xf32>
    %35 = vector.broadcast %34 : vector<128x1xf32> to vector<128x128xf32>
    %36 = arith.subf %30, %35 : vector<128x128xf32>
    %37 = vector.extract_strided_slice %36 {offsets = [0, 0], sizes = [128, 16], strides = [1, 1]} : vector<128x128xf32> to vector<128x16xf32>
    %c0_25 = arith.constant 0 : index
    %c0_26 = arith.constant 0 : index
    %38 = vector.load %arg10[%c0_25, %c0_26] : memref<128x16xf32, #tpu.memory_space<vmem>>, vector<128x16xf32>
    tpu.vector_store %arg10[%c0_25, %c0_26], %37 {strides = array<i32>} : memref<128x16xf32, #tpu.memory_space<vmem>>, vector<128x16xf32>,
    return
  }
  func.func @transform_0(%arg0: i32) -> (i32, i32) {
    %c0_i32 = arith.constant 0 : i32
    %c0_i32_0 = arith.constant 0 : i32
    return %arg0, %c0_i32 : i32, i32
  }
  func.func @transform_1(%arg0: i32) -> (i32, i32) {
    %c0_i32 = arith.constant 0 : i32
    %c0_i32_0 = arith.constant 0 : i32
    %c0_i32_1 = arith.constant 0 : i32
    return %c0_i32, %c0_i32_0 : i32, i32
  }
  func.func @transform_2(%arg0: i32) -> (i32, i32) {
    %c0_i32 = arith.constant 0 : i32
    %c0_i32_0 = arith.constant 0 : i32
    %c0_i32_1 = arith.constant 0 : i32
    return %c0_i32, %c0_i32_0 : i32, i32
  }
  func.func @transform_3(%arg0: i32) -> (i32, i32) {
    %c0_i32 = arith.constant 0 : i32
    %c0_i32_0 = arith.constant 0 : i32
    %c0_i32_1 = arith.constant 0 : i32
    return %c0_i32, %c0_i32_0 : i32, i32
  }
  func.func @transform_4(%arg0: i32) -> (i32, i32) {
    %c0_i32 = arith.constant 0 : i32
    %c0_i32_0 = arith.constant 0 : i32
    %c0_i32_1 = arith.constant 0 : i32
    return %c0_i32, %c0_i32_0 : i32, i32
  }
  func.func @transform_5(%arg0: i32) -> (i32, i32) {
    %c0_i32 = arith.constant 0 : i32
    %c0_i32_0 = arith.constant 0 : i32
    %c0_i32_1 = arith.constant 0 : i32
    return %c0_i32, %c0_i32_0 : i32, i32
  }
  func.func @transform_6(%arg0: i32) -> (i32, i32) {
    %c0_i32 = arith.constant 0 : i32
    %c0_i32_0 = arith.constant 0 : i32
    %c0_i32_1 = arith.constant 0 : i32
    return %c0_i32, %c0_i32_0 : i32, i32
  }
  func.func @transform_7(%arg0: i32) -> (i32, i32) {
    %c0_i32 = arith.constant 0 : i32
    %c0_i32_0 = arith.constant 0 : i32
    %c0_i32_1 = arith.constant 0 : i32
    return %c0_i32, %c0_i32_0 : i32, i32
  }
  func.func @transform_8(%arg0: i32) -> (i32, i32) {
    %c0_i32 = arith.constant 0 : i32
    %c0_i32_0 = arith.constant 0 : i32
    %c0_i32_1 = arith.constant 0 : i32
    return %c0_i32, %c0_i32_0 : i32, i32
  }
  func.func @transform_9(%arg0: i32) -> (i32, i32) {
    %c0_i32 = arith.constant 0 : i32
    %c0_i32_0 = arith.constant 0 : i32
    return %arg0, %c0_i32 : i32, i32
  }
}

</mosaic_0001>

<bundles_post_ra>
// kernel: net_forward.1
= control target key start
LH: loop header
LB: loop body
LE: loop exit
PB: predicated region body
PF: predicated region fallthrough
CT: control target
= control target key end

     0   :  { %s2845_s0 = inlined_call_operand.hbm [shape: f32[256,32], index: 0, kind: input, shape index: {}]   ;;  %s2846_s1 = inlined_call_operand.hbm [shape: f32[32,64], index: 1, kind: input, shape index: {}]   ;;  %s2847_s2 = inlined_call_operand.vmem [shape: f32[1,64], index: 2, kind: input, shape index: {}]   ;;  %s2848_s3 = inlined_call_operand.hbm [shape: f32[64,64], index: 3, kind: input, shape index: {}]   ;;  %s2849_s4 = inlined_call_operand.vmem [shape: f32[1,64], index: 4, kind: input, shape index: {}]   ;;  %s2850_s5 = inlined_call_operand.hbm [shape: f32[64,64], index: 5, kind: input, shape index: {}]   ;;  %s2851_s6 = inlined_call_operand.vmem [shape: f32[1,64], index: 6, kind: input, shape index: {}]   ;;  %s2852_s7 = inlined_call_operand.hbm [shape: f32[64,128], index: 7, kind: input, shape index: {}]   ;;  %s2853_s8 = inlined_call_operand.vmem [shape: f32[1,128], index: 8, kind: input, shape index: {}]   ;;  %s2854_s9 = inlined_call_operand.vmem [shape: f32[256,16], index: 9, kind: output, shape index: {}]  }
   0x1   :  { %2860 = sst [smem:[#allocation13_spill]] %s2854_s9 }
   0x2   :  { %14 = vsyncpa [#allocation3], 0 }
   0x3   :  { %16 = vsyncpa [#allocation3 + $0x1], 0 }
   0x4   :  { %17 = vsyncpa [#allocation5], 0 }
   0x5   :  { %18 = vsyncpa [#allocation8], 0  ;;  %s2376_s30 = smov 0   ;;  %s2378_s10 = smov 0  }
   0x6   :  { %s2380_s11 = smov 0   ;;  %s2382_s12 = smov 0  }
   0x7 LB: > { %s2857_s13 = sadd.s32 4294967295, %s2317_s12   ;;  %p44_p0 = scmp.ne.s32.totalorder %s2309_s10, %s2305_s30  ;;  %s2317_s12 = sphi %s2382_s12, %s2875_s12   ;;  %s2313_s11 = sphi %s2380_s11, %s2874_s11   ;;  %s2309_s10 = sphi %s2378_s10, %s2873_s10   ;;  %s2305_s30 = sphi %s2376_s30, %s2872_s30  }
   0x8   : > { %p2398_p1 = scmp.eq.s32.totalorder %s2857_s13, 0  ;;  %p1591_p2 = scmp.ge.s32.totalorder %s2317_s12, 1 }
   0x9   : > { %p249_p3 = scmp.lt.s32.totalorder %s2317_s12, 3  ;;  %s2319_s17 = smov [#allocation4]  }
   0xa   : > { %s2861_s14 = scalar_select %p2398_p1, 1, 0 }
   0xb   : > { %p2406_p4 = por %p2398_p1, %p44_p0  ;;  %p2410_p5 = pnand %p1591_p2, %p249_p3 }
   0xc   : > { %s261_s18 = sshll.u32 %s2319_s17, 4  ;;  %s2320_s20 = smov [#allocation7]   ;;  %s2414_s18 = int_to_ptr.vmem [resolvable:$true] %s261_s18 }
   0xd   : > { %s2862_s15 = scalar_select %p2406_p4, 1, 0 }
   0xe   : > { %s2863_s16 = scalar_select %p2410_p5, 1, 0 }
   0xf   : > { %p2005_p6 = pneg %p2410_p5  ;;  %s293_s21 = sshll.u32 %s2320_s20, 4  ;;  %s2424_s21 = int_to_ptr.vmem [resolvable:$true] %s293_s21 }
  0x10   : > { %s2321_s22 = smov [#allocation6]   ;;  %s2133_s26 = scalar_lea.hbm %s2846_s1, 512 }
  0x11   : > { %p2420_p7 = pnand %p2005_p6, %p2398_p1  ;;  %s2426_s23 = sshll.u32 %s2321_s22, 4  ;;  %s278_s23 = int_to_ptr.vmem [resolvable:$true] %s2426_s23 }
  0x12   : > { %p2134_p8 = scmp.ne.s32.totalorder %s2846_s1, %s2133_s26  ;;  %p2140_p12 = scmp.lt.u32.totalorder %s2133_s26, %s2846_s1 }
  0x13   : > { %p2436_p9 = pneg %p2420_p7 }
  0x15   : > { %p2136_p10 = pnand %p2436_p9, %p2134_p8 }
  0x17   : > { %p2137_p11 = pneg %p2136_p10 }
  0x19   : > { %p2142_p13 = pnand %p2140_p12, %p2137_p11 }
  0x1b   : > { %2145 = shalt.err (!%p2142_p13)
}
  0x1c   : > { %s2146_s20 = scalar_lea.vmem %s2414_s18, 512  ;;  %p2154_p6 = scmp.lt.s32.totalorder %s2414_s18, %s2414_s18 }
  0x1d   : > { %p2147_p0 = scmp.ne.s32.totalorder %s2414_s18, %s2146_s20  ;;  %p2155_p1 = scmp.lt.s32.totalorder %s2146_s20, %s2146_s20 }
  0x1f   : > { %p2149_p2 = pnand %p2147_p0, %p2436_p9  ;;  %p2156_p8 = por %p2155_p1, %p2154_p6 }
  0x21   : > { %p2150_p3 = pneg %p2149_p2 }
  0x23   : > { %p2157_p10 = pnand %p2156_p8, %p2150_p3 }
  0x25   : > { %2160 = shalt.err (!%p2157_p10)
}
  0x26   : > { %s2322_s22 = smov 128   ;;  %s2323_s24 = smov 8  }
  0x27   : > { %2008 = dma.hbm_to_vmem [thread:$0]  (!%p2420_p7), %s2846_s1, 512, %s2414_s18, [#allocation5], %s2322_s22, %s2322_s22, %s2323_s24  }
  0x28   : > { %s2161_s30 = scalar_lea.hbm %s2850_s5, 1024 }
  0x29   : > { %p2162_p1 = scmp.ne.s32.totalorder %s2850_s5, %s2161_s30  ;;  %p2168_p13 = scmp.lt.u32.totalorder %s2161_s30, %s2850_s5 }
  0x2b   : > { %p2164_p11 = pnand %p2162_p1, %p2436_p9 }
  0x2d   : > { %p2165_p12 = pneg %p2164_p11 }
  0x2f   : > { %p2170_p0 = pnand %p2168_p13, %p2165_p12 }
  0x31   : > { %2173 = shalt.err (!%p2170_p0)
}
  0x32   : > { %s2174_s18 = scalar_lea.vmem %s2424_s21, 1024  ;;  %p2182_p8 = scmp.lt.s32.totalorder %s2424_s21, %s2424_s21 }
  0x33   : > { %p2175_p2 = scmp.ne.s32.totalorder %s2424_s21, %s2174_s18  ;;  %p2183_p10 = scmp.lt.s32.totalorder %s2174_s18, %s2174_s18 }
  0x35   : > { %p2177_p3 = pnand %p2175_p2, %p2436_p9  ;;  %p2184_p1 = por %p2183_p10, %p2182_p8 }
  0x37   : > { %p2178_p6 = pneg %p2177_p3 }
  0x39   : > { %p2185_p11 = pnand %p2184_p1, %p2178_p6 }
  0x3b   : > { %2188 = shalt.err (!%p2185_p11)
}
  0x3c   : > { %2014 = dma.hbm_to_vmem [thread:$0]  (!%p2420_p7), %s2850_s5, 1024, %s2424_s21, [#allocation8], %s2322_s22, %s2322_s22, %s2323_s24  }
  0x3d   : > { %s2189_s27 = scalar_lea.hbm %s2848_s3, 1024 }
  0x3e   : > { %p2190_p12 = scmp.ne.s32.totalorder %s2848_s3, %s2189_s27  ;;  %p2196_p2 = scmp.lt.u32.totalorder %s2189_s27, %s2848_s3 }
  0x40   : > { %p2192_p13 = pnand %p2190_p12, %p2436_p9 }
  0x42   : > { %p2193_p0 = pneg %p2192_p13 }
  0x44   : > { %p2198_p3 = pnand %p2196_p2, %p2193_p0 }
  0x46   : > { %2201 = shalt.err (!%p2198_p3)
}
  0x47   : > { %s2202_s18 = scalar_lea.vmem %s278_s23, 1024  ;;  %p2210_p1 = scmp.lt.s32.totalorder %s278_s23, %s278_s23 }
  0x48   : > { %p2203_p6 = scmp.ne.s32.totalorder %s278_s23, %s2202_s18  ;;  %p2211_p11 = scmp.lt.s32.totalorder %s2202_s18, %s2202_s18 }
  0x4a   : > { %p2205_p8 = pnand %p2203_p6, %p2436_p9  ;;  %p2212_p4 = por %p2211_p11, %p2210_p1 }
  0x4c   : > { %p2206_p10 = pneg %p2205_p8 }
  0x4e   : > { %p2213_p5 = pnand %p2212_p4, %p2206_p10 }
  0x50   : > { %2216 = shalt.err (!%p2213_p5)
}
  0x51   : > { %2011 = dma.hbm_to_vmem [thread:$0]  (!%p2420_p7), %s2848_s3, 1024, %s278_s23, [#allocation5], %s2322_s22, %s2322_s22, %s2323_s24  }
  0x52   : > { %s2324_s13 = smov [#allocation9]   ;;  %s2217_s28 = scalar_lea.hbm %s2852_s7, 1024 }
  0x53   : > { %s309_s25 = sshll.u32 %s2324_s13, 4  ;;  %p2218_p4 = scmp.ne.s32.totalorder %s2852_s7, %s2217_s28  ;;  %s310_s25 = int_to_ptr.vmem [resolvable:$true] %s309_s25 }
  0x54   : > { %p2224_p13 = scmp.lt.u32.totalorder %s2217_s28, %s2852_s7 }
  0x55   : > { %p2220_p5 = pnand %p2218_p4, %p2436_p9 }
  0x57   : > { %p2221_p12 = pneg %p2220_p5 }
  0x59   : > { %p2226_p0 = pnand %p2224_p13, %p2221_p12 }
  0x5b   : > { %2229 = shalt.err (!%p2226_p0)
}
  0x5c   : > { %s2230_s23 = scalar_lea.vmem %s310_s25, 1024  ;;  %p2238_p8 = scmp.lt.s32.totalorder %s310_s25, %s310_s25 }
  0x5d   : > { %p2231_p2 = scmp.ne.s32.totalorder %s310_s25, %s2230_s23  ;;  %p2239_p10 = scmp.lt.s32.totalorder %s2230_s23, %s2230_s23 }
  0x5f   : > { %p2233_p3 = pnand %p2231_p2, %p2436_p9  ;;  %p2240_p1 = por %p2239_p10, %p2238_p8 }
  0x61   : > { %p2234_p6 = pneg %p2233_p3 }
  0x63   : > { %p2241_p11 = pnand %p2240_p1, %p2234_p6 }
  0x65   : > { %2244 = shalt.err (!%p2241_p11)
}
  0x66   : > { %2017 = dma.hbm_to_vmem [thread:$0]  (!%p2420_p7), %s2852_s7, 1024, %s310_s25, [#allocation8], %s2322_s22, %s2322_s22, %s2323_s24  }
  0x67   : > { %s2530_s29 = sadd.s32 1, %s2317_s12   ;;  %s31_s19 = sadd.s32 1, %s2313_s11 }
  0x68   : > { %s28_s13 = ssub.s32 %s2317_s12, %s2530_s29  ;;  %p38_p9 = scmp.ne.s32.totalorder %s2313_s11, %s2309_s10 }
  0x69   : > { %p29_p4 = scmp.eq.s32.totalorder %s28_s13, 0  ;;  %p39_p5 = scmp.eq.s32.totalorder %s2317_s12, 0 }
  0x6a   : > { %p2026_p12 = scmp.lt.s32.totalorder %s2317_s12, 2  ;;  %s326_s26 = sand.u32 1, %s2313_s11  }
  0x6b   : > { %s2541_s27 = scalar_select %p29_p4, %s2313_s11, %s31_s19  }
  0x6c   : > { %p40_p13 = por %p39_p5, %p38_p9  ;;  %s1597_s28 = sshll.u32 %s326_s26, 7 }
  0x6d   : > { %s1678_s30 = sshll.u32 %s2317_s12, 11  ;;  %s330_s25 = scalar_lea.vmem [#allocation2], %s1597_s28 }
  0x6e   : > { %s2547_s18 = scalar_lea.hbm %s2845_s0, %s1678_s30  ;;  %s337_s23 = sshll.u32 %s330_s25, 4  ;;  %s2553_s23 = int_to_ptr.vmem [resolvable:$true] %s337_s23 }
  0x6f   : > { %p2549_p7 = pnand %p2026_p12, %p40_p13  ;;  %s2555_s9 = scalar_lea.sflag [#allocation3], %s326_s26 }
  0x70   : > { %s2245_s19 = scalar_lea.hbm %s2547_s18, 2048  ;;  %s2250_s30 = scalar_lea.hbm %s2845_s0, 4096 }
  0x71   : > { %p2246_p0 = scmp.ne.s32.totalorder %s2547_s18, %s2245_s19  ;;  %p2247_p2 = pneg %p2549_p7 }
  0x72   : > { %p2251_p8 = scmp.lt.u32.totalorder %s2547_s18, %s2845_s0  ;;  %p2252_p10 = scmp.lt.u32.totalorder %s2250_s30, %s2245_s19 }
  0x73   : > { %p2248_p3 = pnand %p2247_p2, %p2246_p0  ;;  %p2254_p11 = scmp.lt.u32.totalorder %s2245_s19, %s2547_s18 }
  0x74   : > { %p2253_p1 = por %p2252_p10, %p2251_p8 }
  0x75   : > { %p2249_p6 = pneg %p2248_p3 }
  0x76   : > { %p2255_p9 = por %p2254_p11, %p2253_p1 }
  0x78   : > { %p2256_p4 = pnand %p2255_p9, %p2249_p6 }
  0x7a   : > { %2259 = shalt.err (!%p2256_p4)
}
  0x7b   : > { %s2260_s26 = scalar_lea.vmem %s2553_s23, 2048  ;;  %s2325_s25 = smov [#allocation2]  }
  0x7c   : > { %p2261_p5 = scmp.ne.s32.totalorder %s2553_s23, %s2260_s26  ;;  %s2265_s13 = sshll.u32 %s2325_s25, 4  ;;  %s2266_s13 = int_to_ptr.vmem [resolvable:$false] %s2265_s13 }
  0x7d   : > { %s2267_s28 = scalar_lea.vmem %s2266_s13, 4096  ;;  %p2268_p0 = scmp.lt.s32.totalorder %s2553_s23, %s2266_s13 }
  0x7e   : > { %p2263_p12 = pnand %p2261_p5, %p2247_p2  ;;  %p2269_p3 = scmp.lt.s32.totalorder %s2267_s28, %s2260_s26 }
  0x80   : > { %p2264_p13 = pneg %p2263_p12  ;;  %p2270_p8 = por %p2269_p3, %p2268_p0 }
  0x82   : > { %p2271_p10 = pnand %p2270_p8, %p2264_p13 }
  0x84   : > { %2274 = shalt.err (!%p2271_p10)
}
  0x85   : > { %2021 = dma.hbm_to_vmem [thread:$0]  (!%p2549_p7), %s2547_s18, 2048, %s2553_s23, %s2555_s9, %s2322_s22, %s2322_s22, %s2323_s24  }
  0x86   : > { %p2867_p2 = scmp.ne.s32.totalorder %s2863_s16, 0 }
  0x87   : > { %s351_s19 = sand.u32 (!%p2867_p2), 1, %s2309_s10   ;;  %p2868_p6 = scmp.ne.s32.totalorder (!%p2867_p2), %s2862_s15, 0 }
  0x88   : > { %349 = sbr.rel (%p2867_p2) target bundleno = 1376 (0x560), region = 56  ;;  %s1601_s30 = sshll.u32 (!%p2867_p2), %s351_s19, 7 }
  0x89   : > { %s352_s17 = scalar_lea.sflag (!%p2867_p2), [#allocation3], %s351_s19  ;;  %s2589_s20 = scalar_lea.vmem (!%p2867_p2), [#allocation2], %s1601_s30 }
  0x8f   : > { %2292 = dma.done.wait (%p2868_p6), %s352_s17, 2048  }
  0x90   : > { %2294 = vsyncadd (%p2868_p6), %s352_s17, 4294965248  ;;  %p2869_p1 = scmp.ne.s32.totalorder %s2861_s14, 0 }
  0x92   : > { %2296 = dma.done.wait (%p2869_p1), [#allocation5], 1536  }
  0x93   : > { %2298 = vsyncadd (%p2869_p1), [#allocation5], 4294965760 }
  0x94   : > { %2300 = dma.done.wait (%p2869_p1), [#allocation8], 2048  }
  0x95   : > { %2302 = vsyncadd (%p2869_p1), [#allocation8], 4294965248  ;;  %vm440_vm0 = vcmask 261120   ;;  %v429_v0 = vld [vmem:[#allocation4] sm:$0xff]  ;;  %v430_v1 = vld [vmem:[#allocation4 + $0x8] sm:$0xff]  ;;  %vm665_vm1 = vcmask 523264  }
  0x96   : > { %v431_v2 = vld [vmem:[#allocation4 + $0x10] sm:$0xff]  ;;  %v1923_v3 = vpack.c.bf16 %v430_v1, %v429_v0  ;;  %v432_v4 = vld [vmem:[#allocation4 + $0x18] sm:$0xff]  ;;  %v413_v5 = vld [vmem:[%s2589_s20] sm:$0xff]  ;;  %s2870_s9 = sadd.s32 4294967295, %s2317_s12   ;;  %s2871_s19 = sld [smem:[#allocation13_spill]]  ;;  %vm1467_vm2 = vcmask 130048  }
  0x97   : > { %v1927_v6 = vpack.c.bf16 %v432_v4, %v431_v2  ;;  %1779 = vmatprep.mubr.msk.f32.mxu0 %vm440_vm0, %v413_v5  ;;  %v650_v7 = vld [vmem:[#allocation6] sm:$0xff]  ;;  %v651_v8 = vld [vmem:[#allocation6 + $0x8] sm:$0xff]  ;;  %v652_v9 = vld [vmem:[#allocation6 + $0x10] sm:$0xff]  ;;  %s1606_s26 = sshll.u32 %s2870_s9, 4 }
  0x98   : > { %1924 = vmatprep.subr.bf16.mxu0 %v1923_v3  ;;  %v653_v10 = vld [vmem:[#allocation6 + $0x18] sm:$0xff]  ;;  %v414_v11 = vld [vmem:[%s2589_s20 + $0x8] sm:$0xff]  ;;  %v1931_v12 = vpack.c.bf16 %v651_v8, %v650_v7  ;;  %v415_v14 = vld [vmem:[%s2589_s20 + $0x10] sm:$0xff]  ;;  %p408_p7 = scmp.lt.s32.totalorder %s1606_s26, 31 }
  0x99   : > { %1926 = vmatpush3.bf16.msra.mxu0 %v1923_v3  ;;  %v1935_v13 = vpack.c.bf16 %v653_v10, %v652_v9  ;;  %v654_v15 = vld [vmem:[#allocation6 + $0x20] sm:$0xff]  ;;  %v655_v16 = vld [vmem:[#allocation6 + $0x28] sm:$0xff]  ;;  %v416_v17 = vld [vmem:[%s2589_s20 + $0x18] sm:$0xff] }
  0x9a   : > { %1928 = vmatprep.subr.bf16.mxu0 %v1927_v6  ;;  %1932 = vmatprep.subr.bf16.mxu1 %v1931_v12  ;;  %v1939_v18 = vpack.c.bf16 %v655_v16, %v654_v15  ;;  %v417_v19 = vld [vmem:[%s2589_s20 + $0x20] sm:$0xff]  ;;  %v418_v20 = vld [vmem:[%s2589_s20 + $0x28] sm:$0xff]  ;;  %v419_v21 = vld [vmem:[%s2589_s20 + $0x30] sm:$0xff]  ;;  %s2877_s26 = smov (!%p408_p7, %s1606_s26), 31 }
  0x9b   : > { %1934 = vmatpush3.bf16.msra.mxu1 %v1931_v12  ;;  %v420_v22 = vld [vmem:[%s2589_s20 + $0x38] sm:$0xff]  ;;  %v421_v23 = vld [vmem:[%s2589_s20 + $0x40] sm:$0xff]  ;;  %v422_v24 = vld [vmem:[%s2589_s20 + $0x48] sm:$0xff]  ;;  %s1607_s25 = sshll.u32 %s2877_s26, 3 }
  0x9c   : > { %1936 = vmatprep.subr.bf16.mxu1 %v1935_v13  ;;  %v423_v25 = vld [vmem:[%s2589_s20 + $0x50] sm:$0xff]  ;;  %v424_v26 = vld [vmem:[%s2589_s20 + $0x58] sm:$0xff]  ;;  %v425_v27 = vld [vmem:[%s2589_s20 + $0x60] sm:$0xff]  ;;  %s2782_s30 = scalar_lea.vmem %s2871_s19, %s1607_s25 }
  0x9d   : > { %1930 = vmatpush3.bf16.msra.mxu0 %v1927_v6  ;;  %v426_v28 = vld [vmem:[%s2589_s20 + $0x68] sm:$0xff]  ;;  %v427_v29 = vld [vmem:[%s2589_s20 + $0x70] sm:$0xff]  ;;  %v428_v30 = vld [vmem:[%s2589_s20 + $0x78] sm:$0xff] }
  0x9e   : > { %v656_v31 = vld [vmem:[#allocation6 + $0x30] sm:$0xff]  ;;  %v657_v32 = vld [vmem:[#allocation6 + $0x38] sm:$0xff]  ;;  %v875_v34 = vld [vmem:[#allocation7] sm:$0xff] }
  0x9f   : > { %1938 = vmatpush3.bf16.msra.mxu1 %v1935_v13  ;;  %v1943_v33 = vpack.c.bf16 %v657_v32, %v656_v31  ;;  %v876_v35 = vld [vmem:[#allocation7 + $0x8] sm:$0xff]  ;;  %v877_v36 = vld [vmem:[#allocation7 + $0x10] sm:$0xff]  ;;  %v878_v38 = vld [vmem:[#allocation7 + $0x18] sm:$0xff] }
  0xa0   : > { %1780 = vmatmul.mubr.msk.f32.vlgmr.msra.gmra.mrb[0].mxu0 %vm440_vm0, %v414_v11  ;;  %1940 = vmatprep.subr.bf16.mxu1 %v1939_v18  ;;  %v1947_v37 = vpack.c.bf16 %v876_v35, %v875_v34  ;;  %v1951_v39 = vpack.c.bf16 %v878_v38, %v877_v36  ;;  %v879_v40 = vld [vmem:[#allocation7 + $0x20] sm:$0xff]  ;;  %v880_v41 = vld [vmem:[#allocation7 + $0x28] sm:$0xff]  ;;  %v881_v43 = vld [vmem:[#allocation7 + $0x30] sm:$0xff] }
  0xa1   : > { %1782 = vmatprep.mubr.msk.f32.mxu0 %vm440_vm0, %v415_v14  ;;  %v1955_v42 = vpack.c.bf16 %v880_v41, %v879_v40  ;;  %v882_v44 = vld [vmem:[#allocation7 + $0x38] sm:$0xff]  ;;  %v1608_v46 = vld [vmem:[%s2847_s2] ss:$0 sm:$0xff]  ;;  %v1100_v32 = vld [vmem:[#allocation9 + $0x8] sm:$0xff] }
  0xa2   : > { %1948 = vmatprep.subr.bf16.mxu0 %v1947_v37  ;;  %v1959_v45 = vpack.c.bf16 %v882_v44, %v881_v43  ;;  %v1099_v31 = vld [vmem:[#allocation9] sm:$0xff]  ;;  %v1102_v35 = vld [vmem:[#allocation9 + $0x18] sm:$0xff]  ;;  %v1104_v38 = vld [vmem:[#allocation9 + $0x28] sm:$0xff] }
  0xa3   : > { %1942 = vmatpush3.bf16.msra.mxu1 %v1939_v18  ;;  %1950 = vmatpush3.bf16.msra.mxu0 %v1947_v37  ;;  %v1963_v34 = vpack.c.bf16 %v1100_v32, %v1099_v31  ;;  %v1103_v37 = vld [vmem:[#allocation9 + $0x20] sm:$0xff]  ;;  %v1105_v40 = vld [vmem:[#allocation9 + $0x30] sm:$0xff]  ;;  %v1106_v41 = vld [vmem:[#allocation9 + $0x38] sm:$0xff] }
  0xa4   : > { %1783 = vmatmul.mubr.msk.f32.gmra.mrb[2].mxu0 %vm440_vm0, %v416_v17  ;;  %1944 = vmatprep.subr.bf16.mxu1 %v1943_v33  ;;  %v2657_v43 = vld [vmem:[%s2849_s4] ss:$0 sm:$0xff] }
  0xa5   : > { %1785 = vmatprep.mubr.msk.f32.mxu0 %vm440_vm0, %v417_v19  ;;  %1952 = vmatprep.subr.bf16.mxu0 %v1951_v39 }
  0xa7   : > { %1946 = vmatpush3.bf16.msra.mxu1 %v1943_v33  ;;  %1954 = vmatpush3.bf16.msra.mxu0 %v1951_v39  ;;  %v1101_v33 = vld [vmem:[#allocation9 + $0x10] sm:$0xff]  ;;  %v1971_v39 = vpack.c.bf16 %v1104_v38, %v1103_v37 }
  0xa8   : > { %1786 = vmatmul.mubr.msk.f32.gmra.mrb[4].mxu0 %vm440_vm0, %v418_v20  ;;  %1956 = vmatprep.subr.bf16.mxu0 %v1955_v42  ;;  %v1967_v36 = vpack.c.bf16 %v1102_v35, %v1101_v33 }
  0xa9   : > { %1788 = vmatprep.mubr.msk.f32.mxu0 %vm440_vm0, %v419_v21  ;;  %1979 = vmatprep.subr.bf16.mxu1 %v1963_v34 }
  0xab   : > { %1958 = vmatpush3.bf16.msra.mxu0 %v1955_v42  ;;  %v1975_v42 = vpack.c.bf16 %v1106_v41, %v1105_v40 }
  0xac   : > { %1789 = vmatmul.mubr.msk.f32.gmra.mrb[6].mxu0 %vm440_vm0, %v420_v22  ;;  %1960 = vmatprep.subr.bf16.mxu0 %v1959_v45 }
  0xad   : > { %1791 = vmatprep.mubr.msk.f32.mxu0 %vm440_vm0, %v421_v23 }
  0xaf   : > { %1962 = vmatpush3.bf16.msra.mxu0 %v1959_v45 }
  0xb0   : > { %1792 = vmatmul.mubr.msk.f32.gmra.mrb[8].mxu0 %vm440_vm0, %v422_v24  ;;  %1964 = vmatprep.subr.bf16.mxu0 %v1963_v34 }
  0xb1   : > { %1794 = vmatprep.mubr.msk.f32.mxu0 %vm440_vm0, %v423_v25 }
  0xb4   : > { %1795 = vmatmul.mubr.msk.f32.gmra.mrb[10].mxu0 %vm440_vm0, %v424_v26 }
  0xb5   : > { %1797 = vmatprep.mubr.msk.f32.mxu0 %vm440_vm0, %v425_v27 }
  0xb8   : > { %1798 = vmatmul.mubr.msk.f32.gmra.mrb[12].mxu0 %vm440_vm0, %v426_v28 }
  0xb9   : > { %1800 = vmatprep.mubr.msk.f32.mxu0 %vm440_vm0, %v427_v29 }
  0xbc   : > { %1801 = vmatmul.mubr.msk.f32.gmra.mrb[14].mxu0 %vm440_vm0, %v428_v30 }
 0x173   : > { %v1781_v47 = vpop.f32.mrb[0].mxu0 }
 0x174   : > { %v561_v48 = vadd.f32 %v1781_v47, %v1608_v46  ;;  %v555_v49 = vpop.f32.mrb[1].mxu0 }
 0x175   : > { %v556_v50 = vadd.f32 %v1608_v46, %v555_v49 }
 0x176   : > { %v635_v53 = vmax.f32 %v561_v48, 0.0 }
 0x177   : > { %v634_v51 = vmax.f32 %v556_v50, 0.0  ;;  %v1784_v52 = vpop.f32.mrb[2].mxu0 }
 0x178   : > { %v571_v54 = vadd.f32 %v1784_v52, %v1608_v46  ;;  %v565_v55 = vpop.f32.mrb[3].mxu0 }
 0x179   : > { %v566_v56 = vadd.f32 %v1608_v46, %v565_v55  ;;  %1819 = vmatprep.mubr.msk.f32.mxu1 %vm665_vm1, %v634_v51 }
 0x17a   : > { %1820 = vmatmul.mubr.msk.f32.vlgmr.msra.gmra.mrb[0].mxu1 %vm665_vm1, %v635_v53  ;;  %v637_v59 = vmax.f32 %v571_v54, 0.0 }
 0x17b   : > { %v636_v57 = vmax.f32 %v566_v56, 0.0  ;;  %v1787_v58 = vpop.f32.mrb[4].mxu0  ;;  %1983 = vmatpush3.bf16.msra.mxu1 %v1963_v34 }
 0x17c   : > { %v581_v60 = vadd.f32 %v1787_v58, %v1608_v46  ;;  %v575_v61 = vpop.f32.mrb[5].mxu0  ;;  %1980 = vmatprep.subr.bf16.mxu1 %v1967_v36 }
 0x17d   : > { %v576_v62 = vadd.f32 %v1608_v46, %v575_v61  ;;  %1822 = vmatprep.mubr.msk.f32.mxu1 %vm665_vm1, %v636_v57 }
 0x17e   : > { %v639_v63 = vmax.f32 %v581_v60, 0.0  ;;  %1823 = vmatmul.mubr.msk.f32.gmra.mrb[2].mxu1 %vm665_vm1, %v637_v59 }
 0x17f   : > { %v638_v0 = vmax.f32 %v576_v62, 0.0  ;;  %v1790_v1 = vpop.f32.mrb[6].mxu0  ;;  %1984 = vmatpush3.bf16.msra.mxu1 %v1967_v36 }
 0x180   : > { %v591_v2 = vadd.f32 %v1790_v1, %v1608_v46  ;;  %v585_v3 = vpop.f32.mrb[7].mxu0  ;;  %1981 = vmatprep.subr.bf16.mxu1 %v1971_v39 }
 0x181   : > { %v586_v4 = vadd.f32 %v1608_v46, %v585_v3  ;;  %1825 = vmatprep.mubr.msk.f32.mxu1 %vm665_vm1, %v638_v0 }
 0x182   : > { %v641_v5 = vmax.f32 %v591_v2, 0.0  ;;  %1826 = vmatmul.mubr.msk.f32.gmra.mrb[4].mxu1 %vm665_vm1, %v639_v63 }
 0x183   : > { %v640_v6 = vmax.f32 %v586_v4, 0.0  ;;  %v1793_v7 = vpop.f32.mrb[8].mxu0  ;;  %1985 = vmatpush3.bf16.msra.mxu1 %v1971_v39 }
 0x184   : > { %v601_v8 = vadd.f32 %v1793_v7, %v1608_v46  ;;  %v595_v9 = vpop.f32.mrb[9].mxu0  ;;  %1982 = vmatprep.subr.bf16.mxu1 %v1975_v42 }
 0x185   : > { %v596_v10 = vadd.f32 %v1608_v46, %v595_v9  ;;  %1828 = vmatprep.mubr.msk.f32.mxu1 %vm665_vm1, %v640_v6 }
 0x186   : > { %v643_v11 = vmax.f32 %v601_v8, 0.0  ;;  %1829 = vmatmul.mubr.msk.f32.gmra.mrb[6].mxu1 %vm665_vm1, %v641_v5 }
 0x187   : > { %v642_v12 = vmax.f32 %v596_v10, 0.0  ;;  %v1796_v13 = vpop.f32.mrb[10].mxu0  ;;  %1986 = vmatpush3.bf16.msra.mxu1 %v1975_v42 }
 0x188   : > { %v611_v14 = vadd.f32 %v1796_v13, %v1608_v46  ;;  %v605_v15 = vpop.f32.mrb[11].mxu0 }
 0x189   : > { %v606_v16 = vadd.f32 %v1608_v46, %v605_v15  ;;  %1831 = vmatprep.mubr.msk.f32.mxu1 %vm665_vm1, %v642_v12 }
 0x18a   : > { %v645_v17 = vmax.f32 %v611_v14, 0.0  ;;  %1832 = vmatmul.mubr.msk.f32.gmra.mrb[8].mxu1 %vm665_vm1, %v643_v11 }
 0x18b   : > { %v644_v18 = vmax.f32 %v606_v16, 0.0  ;;  %v1799_v19 = vpop.f32.mrb[12].mxu0 }
 0x18c   : > { %v621_v20 = vadd.f32 %v1799_v19, %v1608_v46  ;;  %v615_v21 = vpop.f32.mrb[13].mxu0 }
 0x18d   : > { %v616_v22 = vadd.f32 %v1608_v46, %v615_v21  ;;  %1834 = vmatprep.mubr.msk.f32.mxu1 %vm665_vm1, %v644_v18 }
 0x18e   : > { %v647_v23 = vmax.f32 %v621_v20, 0.0  ;;  %1835 = vmatmul.mubr.msk.f32.gmra.mrb[10].mxu1 %vm665_vm1, %v645_v17 }
 0x18f   : > { %v646_v24 = vmax.f32 %v616_v22, 0.0  ;;  %v1802_v25 = vpop.f32.mrb[14].mxu0 }
 0x190   : > { %v631_v26 = vadd.f32 %v1802_v25, %v1608_v46  ;;  %v625_v27 = vpop.f32.mrb[15].mxu0 }
 0x191   : > { %v626_v28 = vadd.f32 %v1608_v46, %v625_v27  ;;  %1837 = vmatprep.mubr.msk.f32.mxu1 %vm665_vm1, %v646_v24 }
 0x192   : > { %v649_v29 = vmax.f32 %v631_v26, 0.0  ;;  %1838 = vmatmul.mubr.msk.f32.gmra.mrb[12].mxu1 %vm665_vm1, %v647_v23 }
 0x193   : > { %v648_v30 = vmax.f32 %v626_v28, 0.0  ;;  %v1642_v28 = vld [vmem:[%s2851_s6] ss:$0 sm:$0xff] }
 0x195   : > { %1840 = vmatprep.mubr.msk.f32.mxu1 %vm665_vm1, %v648_v30 }
 0x196   : > { %1841 = vmatmul.mubr.msk.f32.gmra.mrb[14].mxu1 %vm665_vm1, %v649_v29 }
 0x24d   : > { %v1821_v44 = vpop.f32.mrb[0].mxu1 }
 0x24e   : > { %v786_v45 = vadd.f32 %v1821_v44, %v2657_v43  ;;  %v780_v46 = vpop.f32.mrb[1].mxu1 }
 0x24f   : > { %v781_v47 = vadd.f32 %v2657_v43, %v780_v46 }
 0x250   : > { %v860_v50 = vmax.f32 %v786_v45, 0.0 }
 0x251   : > { %v859_v48 = vmax.f32 %v781_v47, 0.0  ;;  %v1824_v49 = vpop.f32.mrb[2].mxu1 }
 0x252   : > { %v796_v51 = vadd.f32 %v1824_v49, %v2657_v43  ;;  %v790_v52 = vpop.f32.mrb[3].mxu1 }
 0x253   : > { %v791_v53 = vadd.f32 %v2657_v43, %v790_v52  ;;  %1859 = vmatprep.mubr.msk.f32.mxu0 %vm665_vm1, %v859_v48 }
 0x254   : > { %1860 = vmatmul.mubr.msk.f32.vlgmr.msra.gmra.mrb[16].mxu0 %vm665_vm1, %v860_v50  ;;  %v862_v56 = vmax.f32 %v796_v51, 0.0 }
 0x255   : > { %v861_v54 = vmax.f32 %v791_v53, 0.0  ;;  %v1827_v55 = vpop.f32.mrb[4].mxu1  ;;  %1966 = vmatpush3.bf16.msra.mxu0 %v1963_v34 }
 0x256   : > { %v806_v57 = vadd.f32 %v1827_v55, %v2657_v43  ;;  %v800_v58 = vpop.f32.mrb[5].mxu1  ;;  %1968 = vmatprep.subr.bf16.mxu0 %v1967_v36 }
 0x257   : > { %v801_v59 = vadd.f32 %v2657_v43, %v800_v58  ;;  %1862 = vmatprep.mubr.msk.f32.mxu0 %vm665_vm1, %v861_v54 }
 0x258   : > { %v864_v60 = vmax.f32 %v806_v57, 0.0  ;;  %1863 = vmatmul.mubr.msk.f32.gmra.mrb[18].mxu0 %vm665_vm1, %v862_v56 }
 0x259   : > { %v863_v61 = vmax.f32 %v801_v59, 0.0  ;;  %v1830_v62 = vpop.f32.mrb[6].mxu1  ;;  %1970 = vmatpush3.bf16.msra.mxu0 %v1967_v36 }
 0x25a   : > { %v816_v63 = vadd.f32 %v1830_v62, %v2657_v43  ;;  %v810_v0 = vpop.f32.mrb[7].mxu1  ;;  %1972 = vmatprep.subr.bf16.mxu0 %v1971_v39 }
 0x25b   : > { %v811_v1 = vadd.f32 %v2657_v43, %v810_v0  ;;  %1865 = vmatprep.mubr.msk.f32.mxu0 %vm665_vm1, %v863_v61 }
 0x25c   : > { %v866_v2 = vmax.f32 %v816_v63, 0.0  ;;  %1866 = vmatmul.mubr.msk.f32.gmra.mrb[20].mxu0 %vm665_vm1, %v864_v60 }
 0x25d   : > { %v865_v3 = vmax.f32 %v811_v1, 0.0  ;;  %v1833_v4 = vpop.f32.mrb[8].mxu1  ;;  %1974 = vmatpush3.bf16.msra.mxu0 %v1971_v39 }
 0x25e   : > { %v826_v5 = vadd.f32 %v1833_v4, %v2657_v43  ;;  %v820_v6 = vpop.f32.mrb[9].mxu1  ;;  %1976 = vmatprep.subr.bf16.mxu0 %v1975_v42 }
 0x25f   : > { %v821_v7 = vadd.f32 %v2657_v43, %v820_v6  ;;  %1868 = vmatprep.mubr.msk.f32.mxu0 %vm665_vm1, %v865_v3 }
 0x260   : > { %v868_v8 = vmax.f32 %v826_v5, 0.0  ;;  %1869 = vmatmul.mubr.msk.f32.gmra.mrb[22].mxu0 %vm665_vm1, %v866_v2 }
 0x261   : > { %v867_v9 = vmax.f32 %v821_v7, 0.0  ;;  %v1836_v10 = vpop.f32.mrb[10].mxu1  ;;  %1978 = vmatpush3.bf16.msra.mxu0 %v1975_v42 }
 0x262   : > { %v836_v11 = vadd.f32 %v1836_v10, %v2657_v43  ;;  %v830_v12 = vpop.f32.mrb[11].mxu1 }
 0x263   : > { %v831_v13 = vadd.f32 %v2657_v43, %v830_v12  ;;  %1871 = vmatprep.mubr.msk.f32.mxu0 %vm665_vm1, %v867_v9 }
 0x264   : > { %v870_v14 = vmax.f32 %v836_v11, 0.0  ;;  %1872 = vmatmul.mubr.msk.f32.gmra.mrb[24].mxu0 %vm665_vm1, %v868_v8 }
 0x265   : > { %v869_v15 = vmax.f32 %v831_v13, 0.0  ;;  %v1839_v16 = vpop.f32.mrb[12].mxu1  ;;  %v1659_v13 = vld [vmem:[%s2853_s8] ss:$0 sm:$0xff] }
 0x266   : > { %v846_v17 = vadd.f32 %v1839_v16, %v2657_v43  ;;  %v840_v18 = vpop.f32.mrb[13].mxu1 }
 0x267   : > { %v841_v19 = vadd.f32 %v2657_v43, %v840_v18  ;;  %1874 = vmatprep.mubr.msk.f32.mxu0 %vm665_vm1, %v869_v15 }
 0x268   : > { %v872_v20 = vmax.f32 %v846_v17, 0.0  ;;  %1875 = vmatmul.mubr.msk.f32.gmra.mrb[26].mxu0 %vm665_vm1, %v870_v14 }
 0x269   : > { %v871_v21 = vmax.f32 %v841_v19, 0.0  ;;  %v1842_v22 = vpop.f32.mrb[14].mxu1 }
 0x26a   : > { %v856_v23 = vadd.f32 %v1842_v22, %v2657_v43  ;;  %v850_v24 = vpop.f32.mrb[15].mxu1 }
 0x26b   : > { %v851_v25 = vadd.f32 %v2657_v43, %v850_v24  ;;  %1877 = vmatprep.mubr.msk.f32.mxu0 %vm665_vm1, %v871_v21 }
 0x26c   : > { %v874_v26 = vmax.f32 %v856_v23, 0.0  ;;  %1878 = vmatmul.mubr.msk.f32.gmra.mrb[28].mxu0 %vm665_vm1, %v872_v20 }
 0x26d   : > { %v873_v27 = vmax.f32 %v851_v25, 0.0 }
 0x26f   : > { %1880 = vmatprep.mubr.msk.f32.mxu0 %vm665_vm1, %v873_v27 }
 0x270   : > { %1881 = vmatmul.mubr.msk.f32.gmra.mrb[30].mxu0 %vm665_vm1, %v874_v26 }
 0x327   : > { %v1861_v29 = vpop.f32.mrb[16].mxu0 }
 0x328   : > { %v1010_v30 = vadd.f32 %v1861_v29, %v1642_v28  ;;  %v1004_v31 = vpop.f32.mrb[17].mxu0 }
 0x329   : > { %v1005_v32 = vadd.f32 %v1642_v28, %v1004_v31 }
 0x32a   : > { %v1084_v35 = vmax.f32 %v1010_v30, 0.0 }
 0x32b   : > { %v1083_v33 = vmax.f32 %v1005_v32, 0.0  ;;  %v1864_v34 = vpop.f32.mrb[18].mxu0 }
 0x32c   : > { %v1020_v36 = vadd.f32 %v1864_v34, %v1642_v28  ;;  %v1014_v37 = vpop.f32.mrb[19].mxu0 }
 0x32d   : > { %v1015_v38 = vadd.f32 %v1642_v28, %v1014_v37  ;;  %1899 = vmatprep.mubr.msk.f32.mxu0 %vm665_vm1, %v1083_v33 }
 0x32e   : > { %1900 = vmatmul.mubr.msk.f32.vlgmr.msra.gmra.mrb[32].mxu0 %vm665_vm1, %v1084_v35  ;;  %v1086_v41 = vmax.f32 %v1020_v36, 0.0 }
 0x32f   : > { %v1085_v39 = vmax.f32 %v1015_v38, 0.0  ;;  %v1867_v40 = vpop.f32.mrb[20].mxu0 }
 0x330   : > { %v1030_v42 = vadd.f32 %v1867_v40, %v1642_v28  ;;  %v1024_v43 = vpop.f32.mrb[21].mxu0 }
 0x331   : > { %v1025_v44 = vadd.f32 %v1642_v28, %v1024_v43  ;;  %1902 = vmatprep.mubr.msk.f32.mxu1 %vm665_vm1, %v1085_v39 }
 0x332   : > { %1903 = vmatmul.mubr.msk.f32.vlgmr.msra.gmra.mrb[16].mxu1 %vm665_vm1, %v1086_v41  ;;  %v1088_v47 = vmax.f32 %v1030_v42, 0.0 }
 0x333   : > { %v1087_v45 = vmax.f32 %v1025_v44, 0.0  ;;  %v1870_v46 = vpop.f32.mrb[22].mxu0 }
 0x334   : > { %v1040_v48 = vadd.f32 %v1870_v46, %v1642_v28  ;;  %v1034_v49 = vpop.f32.mrb[23].mxu0 }
 0x335   : > { %v1035_v50 = vadd.f32 %v1642_v28, %v1034_v49  ;;  %1905 = vmatprep.mubr.msk.f32.mxu1 %vm665_vm1, %v1087_v45 }
 0x336   : > { %1906 = vmatmul.mubr.msk.f32.gmra.mrb[18].mxu1 %vm665_vm1, %v1088_v47  ;;  %v1090_v53 = vmax.f32 %v1040_v48, 0.0 }
 0x337   : > { %v1089_v51 = vmax.f32 %v1035_v50, 0.0  ;;  %v1873_v52 = vpop.f32.mrb[24].mxu0 }
 0x338   : > { %v1050_v54 = vadd.f32 %v1873_v52, %v1642_v28  ;;  %v1044_v55 = vpop.f32.mrb[25].mxu0 }
 0x339   : > { %v1045_v56 = vadd.f32 %v1642_v28, %v1044_v55  ;;  %1908 = vmatprep.mubr.msk.f32.mxu1 %vm665_vm1, %v1089_v51 }
 0x33a   : > { %1909 = vmatmul.mubr.msk.f32.gmra.mrb[20].mxu1 %vm665_vm1, %v1090_v53  ;;  %v1092_v59 = vmax.f32 %v1050_v54, 0.0 }
 0x33b   : > { %v1091_v57 = vmax.f32 %v1045_v56, 0.0  ;;  %v1876_v58 = vpop.f32.mrb[26].mxu0 }
 0x33c   : > { %v1060_v60 = vadd.f32 %v1876_v58, %v1642_v28  ;;  %v1054_v61 = vpop.f32.mrb[27].mxu0 }
 0x33d   : > { %v1055_v62 = vadd.f32 %v1642_v28, %v1054_v61  ;;  %1911 = vmatprep.mubr.msk.f32.mxu1 %vm665_vm1, %v1091_v57 }
 0x33e   : > { %1912 = vmatmul.mubr.msk.f32.gmra.mrb[22].mxu1 %vm665_vm1, %v1092_v59  ;;  %v1094_v1 = vmax.f32 %v1060_v60, 0.0 }
 0x33f   : > { %v1093_v63 = vmax.f32 %v1055_v62, 0.0  ;;  %v1879_v0 = vpop.f32.mrb[28].mxu0 }
 0x340   : > { %v1070_v2 = vadd.f32 %v1879_v0, %v1642_v28  ;;  %v1064_v3 = vpop.f32.mrb[29].mxu0 }
 0x341   : > { %v1065_v4 = vadd.f32 %v1642_v28, %v1064_v3  ;;  %1914 = vmatprep.mubr.msk.f32.mxu1 %vm665_vm1, %v1093_v63 }
 0x342   : > { %1915 = vmatmul.mubr.msk.f32.gmra.mrb[24].mxu1 %vm665_vm1, %v1094_v1  ;;  %v1096_v7 = vmax.f32 %v1070_v2, 0.0 }
 0x343   : > { %v1095_v5 = vmax.f32 %v1065_v4, 0.0  ;;  %v1882_v6 = vpop.f32.mrb[30].mxu0 }
 0x344   : > { %v1080_v8 = vadd.f32 %v1882_v6, %v1642_v28  ;;  %v1074_v9 = vpop.f32.mrb[31].mxu0 }
 0x345   : > { %v1075_v10 = vadd.f32 %v1642_v28, %v1074_v9  ;;  %1917 = vmatprep.mubr.msk.f32.mxu1 %vm665_vm1, %v1095_v5 }
 0x346   : > { %1918 = vmatmul.mubr.msk.f32.gmra.mrb[26].mxu1 %vm665_vm1, %v1096_v7  ;;  %v1098_v12 = vmax.f32 %v1080_v8, 0.0 }
 0x347   : > { %v1097_v11 = vmax.f32 %v1075_v10, 0.0 }
 0x349   : > { %1920 = vmatprep.mubr.msk.f32.mxu1 %vm665_vm1, %v1097_v11 }
 0x34a   : > { %1921 = vmatmul.mubr.msk.f32.gmra.mrb[28].mxu1 %vm665_vm1, %v1098_v12 }
 0x401   : > { %v1901_v14 = vpop.f32.mrb[32].mxu0 }
 0x402   : > { %v1234_v15 = vadd.f32 %v1901_v14, %v1659_v13  ;;  %v1228_v16 = vpop.f32.mrb[33].mxu0 }
 0x403   : > { %v1229_v18 = vadd.f32 %v1659_v13, %v1228_v16 }
 0x404   : > { %1309 = vmax.xlane.f32.xlu0 %v1234_v15 }
 0x405   : > { %v1904_v17 = vpop.f32.mrb[16].mxu1 }
 0x406   : > { %v1244_v19 = vadd.f32 %v1904_v17, %v1659_v13  ;;  %v1238_v20 = vpop.f32.mrb[17].mxu1 }
 0x407   : > { %v1239_v22 = vadd.f32 %v1659_v13, %v1238_v20 }
 0x408   : > { %1313 = vmax.xlane.f32.xlu1 %v1244_v19  ;;  %1307 = vmax.xlane.f32.xlu0 %v1229_v18 }
 0x409   : > { %v1907_v21 = vpop.f32.mrb[18].mxu1 }
 0x40a   : > { %v1248_v23 = vpop.f32.mrb[19].mxu1  ;;  %v1254_v26 = vadd.f32 %v1907_v21, %v1659_v13 }
 0x40b   : > { %v1249_v24 = vadd.f32 %v1659_v13, %v1248_v23 }
 0x40c   : > { %1311 = vmax.xlane.f32.xlu1 %v1239_v22 }
 0x40d   : > { %v1910_v25 = vpop.f32.mrb[20].mxu1  ;;  %1315 = vmax.xlane.f32.xlu0 %v1249_v24 }
 0x40e   : > { %v1258_v27 = vpop.f32.mrb[21].mxu1  ;;  %v1264_v30 = vadd.f32 %v1910_v25, %v1659_v13 }
 0x40f   : > { %v1259_v28 = vadd.f32 %v1659_v13, %v1258_v27 }
 0x410   : > { %1317 = vmax.xlane.f32.xlu1 %v1254_v26 }
 0x411   : > { %v1913_v29 = vpop.f32.mrb[22].mxu1  ;;  %1319 = vmax.xlane.f32.xlu0 %v1259_v28 }
 0x412   : > { %v1268_v31 = vpop.f32.mrb[23].mxu1  ;;  %v1274_v34 = vadd.f32 %v1913_v29, %v1659_v13 }
 0x413   : > { %v1269_v32 = vadd.f32 %v1659_v13, %v1268_v31 }
 0x414   : > { %1321 = vmax.xlane.f32.xlu1 %v1264_v30 }
 0x415   : > { %v1916_v33 = vpop.f32.mrb[24].mxu1  ;;  %1323 = vmax.xlane.f32.xlu0 %v1269_v32 }
 0x416   : > { %v1278_v35 = vpop.f32.mrb[25].mxu1  ;;  %v1284_v38 = vadd.f32 %v1916_v33, %v1659_v13 }
 0x417   : > { %v1279_v36 = vadd.f32 %v1659_v13, %v1278_v35 }
 0x418   : > { %1325 = vmax.xlane.f32.xlu1 %v1274_v34 }
 0x419   : > { %v1919_v37 = vpop.f32.mrb[26].mxu1  ;;  %1327 = vmax.xlane.f32.xlu0 %v1279_v36 }
 0x41a   : > { %v1288_v39 = vpop.f32.mrb[27].mxu1  ;;  %v2716_v42 = vadd.f32 %v1919_v37, %v1659_v13 }
 0x41b   : > { %v2713_v40 = vadd.f32 %v1659_v13, %v1288_v39 }
 0x41c   : > { %1329 = vmax.xlane.f32.xlu1 %v1284_v38 }
 0x41d   : > { %v1922_v41 = vpop.f32.mrb[28].mxu1  ;;  %1331 = vmax.xlane.f32.xlu0 %v2713_v40 }
 0x41e   : > { %v1298_v43 = vpop.f32.mrb[29].mxu1  ;;  %v2722_v45 = vadd.f32 %v1922_v41, %v1659_v13 }
 0x41f   : > { %v2718_v44 = vadd.f32 %v1659_v13, %v1298_v43 }
 0x420   : > { %1333 = vmax.xlane.f32.xlu1 %v2716_v42 }
 0x421   : > { %1335 = vmax.xlane.f32.xlu0 %v2718_v44 }
 0x424   : > { %1337 = vmax.xlane.f32.xlu1 %v2722_v45 }
 0x491   : > { %v1310_v46 = vpop.xlane.xlu0 %1309 }
 0x492   : > { %v2725_v47 = vsub.f32 %v1234_v15, %v1310_v46 }
 0x494   : > { %v1357_v48 = vmul.f32 1.442695, %v2725_v47 }
 0x495   : > { %v1314_v49 = vpop.xlane.xlu1 %1313  ;;  %v1308_v50 = vpop.xlane.xlu0 %1307 }
 0x496   : > { %2069 = vpow2.f32 %v1357_v48  ;;  %v2728_v51 = vsub.f32 %v1244_v19, %v1314_v49  ;;  %v2730_v52 = vsub.f32 %v1229_v18, %v1308_v50 }
 0x498   : > { %v1361_v53 = vmul.f32 1.442695, %v2728_v51  ;;  %v1355_v54 = vmul.f32 1.442695, %v2730_v52 }
 0x499   : > { %v1312_v55 = vpop.xlane.xlu1 %1311 }
 0x49a   : > { %2071 = vpow2.f32 %v1361_v53  ;;  %v2734_v56 = vsub.f32 %v1239_v22, %v1312_v55  ;;  %v1316_v57 = vpop.xlane.xlu0 %1315 }
 0x49b   : > { %2073 = vpow2.f32 %v1355_v54  ;;  %v2736_v58 = vsub.f32 %v1249_v24, %v1316_v57 }
 0x49c   : > { %v1359_v59 = vmul.f32 1.442695, %v2734_v56 }
 0x49d   : > { %v1318_v60 = vpop.xlane.xlu1 %1317  ;;  %v1363_v63 = vmul.f32 1.442695, %v2736_v58 }
 0x49e   : > { %2075 = vpow2.f32 %v1359_v59  ;;  %v2739_v61 = vsub.f32 %v1254_v26, %v1318_v60  ;;  %v1320_v62 = vpop.xlane.xlu0 %1319 }
 0x49f   : > { %v2742_v0 = vsub.f32 %v1259_v28, %v1320_v62 }
 0x4a0   : > { %v2070_v1 = vpop.eup %2069  ;;  %v1365_v2 = vmul.f32 1.442695, %v2739_v61 }
 0x4a1   : > { %v1322_v3 = vpop.xlane.xlu1 %1321  ;;  %1389 = vadd.xlane.f32.xlu1 %v2070_v1  ;;  %v1367_v6 = vmul.f32 1.442695, %v2742_v0 }
 0x4a2   : > { %2077 = vpow2.f32 %v1365_v2  ;;  %v2745_v4 = vsub.f32 %v1264_v30, %v1322_v3  ;;  %v1324_v5 = vpop.xlane.xlu0 %1323 }
 0x4a3   : > { %2079 = vpow2.f32 %v1363_v63  ;;  %v2748_v7 = vsub.f32 %v1269_v32, %v1324_v5 }
 0x4a4   : > { %v2072_v8 = vpop.eup %2071  ;;  %v1369_v9 = vmul.f32 1.442695, %v2745_v4 }
 0x4a5   : > { %v2074_v10 = vpop.eup %2073  ;;  %v1326_v11 = vpop.xlane.xlu1 %1325  ;;  %1393 = vadd.xlane.f32.xlu1 %v2072_v8  ;;  %v1371_v14 = vmul.f32 1.442695, %v2748_v7 }
 0x4a6   : > { %2081 = vpow2.f32 %v1369_v9  ;;  %v2751_v12 = vsub.f32 %v1274_v34, %v1326_v11  ;;  %1387 = vadd.xlane.f32.xlu0 %v2074_v10  ;;  %v1328_v13 = vpop.xlane.xlu0 %1327 }
 0x4a7   : > { %2083 = vpow2.f32 %v1367_v6  ;;  %v2754_v15 = vsub.f32 %v1279_v36, %v1328_v13 }
 0x4a8   : > { %v2076_v16 = vpop.eup %2075  ;;  %v1373_v17 = vmul.f32 1.442695, %v2751_v12 }
 0x4a9   : > { %v1330_v18 = vpop.xlane.xlu1 %1329  ;;  %v1375_v21 = vmul.f32 1.442695, %v2754_v15 }
 0x4aa   : > { %2085 = vpow2.f32 %v1373_v17  ;;  %v2757_v19 = vsub.f32 %v1284_v38, %v1330_v18  ;;  %1391 = vadd.xlane.f32.xlu0 %v2076_v16  ;;  %v1332_v20 = vpop.xlane.xlu0 %1331 }
 0x4ab   : > { %2087 = vpow2.f32 %v1371_v14  ;;  %v2761_v22 = vsub.f32 %v2713_v40, %v1332_v20 }
 0x4ac   : > { %v2078_v23 = vpop.eup %2077  ;;  %v1377_v24 = vmul.f32 1.442695, %v2757_v19 }
 0x4ad   : > { %v2080_v25 = vpop.eup %2079  ;;  %v1334_v26 = vpop.xlane.xlu1 %1333  ;;  %1397 = vadd.xlane.f32.xlu1 %v2078_v23  ;;  %v1379_v29 = vmul.f32 1.442695, %v2761_v22 }
 0x4ae   : > { %2089 = vpow2.f32 %v1377_v24  ;;  %v2765_v27 = vsub.f32 %v2716_v42, %v1334_v26  ;;  %1395 = vadd.xlane.f32.xlu0 %v2080_v25  ;;  %v1336_v28 = vpop.xlane.xlu0 %1335 }
 0x4af   : > { %2091 = vpow2.f32 %v1375_v21  ;;  %v2769_v30 = vsub.f32 %v2718_v44, %v1336_v28 }
 0x4b0   : > { %v2082_v31 = vpop.eup %2081  ;;  %v1381_v32 = vmul.f32 1.442695, %v2765_v27 }
 0x4b1   : > { %v2084_v33 = vpop.eup %2083  ;;  %v1338_v34 = vpop.xlane.xlu1 %1337  ;;  %1401 = vadd.xlane.f32.xlu1 %v2082_v31  ;;  %v1383_v36 = vmul.f32 1.442695, %v2769_v30 }
 0x4b2   : > { %2093 = vpow2.f32 %v1381_v32  ;;  %v2773_v35 = vsub.f32 %v2722_v45, %v1338_v34  ;;  %1399 = vadd.xlane.f32.xlu0 %v2084_v33 }
 0x4b3   : > { %2095 = vpow2.f32 %v1379_v29 }
 0x4b4   : > { %v2086_v37 = vpop.eup %2085  ;;  %v1385_v38 = vmul.f32 1.442695, %v2773_v35 }
 0x4b5   : > { %v2088_v39 = vpop.eup %2087  ;;  %1405 = vadd.xlane.f32.xlu1 %v2086_v37 }
 0x4b6   : > { %2097 = vpow2.f32 %v1385_v38  ;;  %1403 = vadd.xlane.f32.xlu0 %v2088_v39 }
 0x4b7   : > { %2099 = vpow2.f32 %v1383_v36 }
 0x4b8   : > { %v2090_v40 = vpop.eup %2089 }
 0x4b9   : > { %v2092_v41 = vpop.eup %2091  ;;  %1409 = vadd.xlane.f32.xlu1 %v2090_v40 }
 0x4ba   : > { %1407 = vadd.xlane.f32.xlu0 %v2092_v41 }
 0x4bc   : > { %v2094_v42 = vpop.eup %2093 }
 0x4bd   : > { %v2096_v43 = vpop.eup %2095  ;;  %1413 = vadd.xlane.f32.xlu1 %v2094_v42 }
 0x4be   : > { %1411 = vadd.xlane.f32.xlu0 %v2096_v43 }
 0x4c0   : > { %v2098_v44 = vpop.eup %2097 }
 0x4c1   : > { %v2100_v45 = vpop.eup %2099  ;;  %1417 = vadd.xlane.f32.xlu1 %v2098_v44 }
 0x4c2   : > { %1415 = vadd.xlane.f32.xlu0 %v2100_v45 }
 0x52e   : > { %v1390_v46 = vpop.xlane.xlu1 %1389 }
 0x52f   : > { %2101 = vlog2.f32 %v1390_v46 }
 0x532   : > { %v1394_v48 = vpop.xlane.xlu1 %1393 }
 0x533   : > { %2103 = vlog2.f32 %v1394_v48  ;;  %v1388_v49 = vpop.xlane.xlu0 %1387 }
 0x534   : > { %2105 = vlog2.f32 %v1388_v49 }
 0x537   : > { %v1392_v50 = vpop.xlane.xlu0 %1391 }
 0x538   : > { %2107 = vlog2.f32 %v1392_v50 }
 0x539   : > { %v2102_v53 = vpop.eup %2101 }
 0x53a   : > { %v1422_v54 = vmul.f32 0.6931472, %v2102_v53  ;;  %v1398_v55 = vpop.xlane.xlu1 %1397 }
 0x53b   : > { %2109 = vlog2.f32 %v1398_v55  ;;  %v1396_v57 = vpop.xlane.xlu0 %1395 }
 0x53c   : > { %v1452_v59 = vsub.f32 %v2725_v47, %v1422_v54  ;;  %2111 = vlog2.f32 %v1396_v57 }
 0x53d   : > { %v2104_v60 = vpop.eup %2103 }
 0x53e   : > { %v2106_v62 = vpop.eup %2105  ;;  %1469 = vst.msk [vmem:[%s2782_s30 + $0x8] sm:$0xff] %vm1467_vm2, %v1452_v59  ;;  %v1426_v63 = vmul.f32 0.6931472, %v2104_v60  ;;  %v1402_v1 = vpop.xlane.xlu1 %1401 }
 0x53f   : > { %v1420_v2 = vmul.f32 0.6931472, %v2106_v62  ;;  %2113 = vlog2.f32 %v1402_v1  ;;  %v1400_v3 = vpop.xlane.xlu0 %1399 }
 0x540   : > { %v1454_v5 = vsub.f32 %v2728_v51, %v1426_v63  ;;  %2115 = vlog2.f32 %v1400_v3 }
 0x541   : > { %v1451_v6 = vsub.f32 %v2730_v52, %v1420_v2 }
 0x542   : > { %v2108_v8 = vpop.eup %2107  ;;  %1471 = vst.msk [vmem:[%s2782_s30 + $0x18] sm:$0xff] %vm1467_vm2, %v1454_v5  ;;  %v1406_v47 = vpop.xlane.xlu1 %1405 }
 0x543   : > { %1468 = vst.msk [vmem:[%s2782_s30] sm:$0xff] %vm1467_vm2, %v1451_v6  ;;  %v1424_v9 = vmul.f32 0.6931472, %v2108_v8  ;;  %2117 = vlog2.f32 %v1406_v47  ;;  %v1404_v10 = vpop.xlane.xlu0 %1403 }
 0x544   : > { %2119 = vlog2.f32 %v1404_v10 }
 0x545   : > { %v2110_v11 = vpop.eup %2109  ;;  %v1453_v13 = vsub.f32 %v2734_v56, %v1424_v9 }
 0x546   : > { %v2112_v51 = vpop.eup %2111  ;;  %v1430_v14 = vmul.f32 0.6931472, %v2110_v11  ;;  %v1410_v16 = vpop.xlane.xlu1 %1409 }
 0x547   : > { %1470 = vst.msk [vmem:[%s2782_s30 + $0x10] sm:$0xff] %vm1467_vm2, %v1453_v13  ;;  %v1428_v52 = vmul.f32 0.6931472, %v2112_v51  ;;  %2121 = vlog2.f32 %v1410_v16  ;;  %v1408_v17 = vpop.xlane.xlu0 %1407 }
 0x548   : > { %v1456_v18 = vsub.f32 %v2739_v61, %v1430_v14  ;;  %2123 = vlog2.f32 %v1408_v17 }
 0x549   : > { %v2114_v20 = vpop.eup %2113  ;;  %v1455_v21 = vsub.f32 %v2736_v58, %v1428_v52 }
 0x54a   : > { %v2116_v23 = vpop.eup %2115  ;;  %1473 = vst.msk [vmem:[%s2782_s30 + $0x28] sm:$0xff] %vm1467_vm2, %v1456_v18  ;;  %v1434_v56 = vmul.f32 0.6931472, %v2114_v20  ;;  %v1414_v24 = vpop.xlane.xlu1 %1413 }
 0x54b   : > { %1472 = vst.msk [vmem:[%s2782_s30 + $0x20] sm:$0xff] %vm1467_vm2, %v1455_v21  ;;  %v1432_v25 = vmul.f32 0.6931472, %v2116_v23  ;;  %2125 = vlog2.f32 %v1414_v24  ;;  %v1412_v26 = vpop.xlane.xlu0 %1411 }
 0x54c   : > { %v1458_v28 = vsub.f32 %v2745_v4, %v1434_v56  ;;  %2127 = vlog2.f32 %v1412_v26 }
 0x54d   : > { %v2118_v61 = vpop.eup %2117  ;;  %v1457_v29 = vsub.f32 %v2742_v0, %v1432_v25 }
 0x54e   : > { %v2120_v58 = vpop.eup %2119  ;;  %1475 = vst.msk [vmem:[%s2782_s30 + $0x38] sm:$0xff] %vm1467_vm2, %v1458_v28  ;;  %v1438_v31 = vmul.f32 0.6931472, %v2118_v61  ;;  %v1418_v32 = vpop.xlane.xlu1 %1417 }
 0x54f   : > { %1474 = vst.msk [vmem:[%s2782_s30 + $0x30] sm:$0xff] %vm1467_vm2, %v1457_v29  ;;  %v1436_v33 = vmul.f32 0.6931472, %v2120_v58  ;;  %2129 = vlog2.f32 %v1418_v32  ;;  %v1416_v34 = vpop.xlane.xlu0 %1415 }
 0x550   : > { %v1460_v4 = vsub.f32 %v2751_v12, %v1438_v31  ;;  %2131 = vlog2.f32 %v1416_v34 }
 0x551   : > { %v2122_v36 = vpop.eup %2121  ;;  %v1459_v37 = vsub.f32 %v2748_v7, %v1436_v33 }
 0x552   : > { %v2124_v0 = vpop.eup %2123  ;;  %1477 = vst.msk [vmem:[%s2782_s30 + $0x48] sm:$0xff] %vm1467_vm2, %v1460_v4  ;;  %v1442_v38 = vmul.f32 0.6931472, %v2122_v36 }
 0x553   : > { %1476 = vst.msk [vmem:[%s2782_s30 + $0x40] sm:$0xff] %vm1467_vm2, %v1459_v37  ;;  %v1440_v39 = vmul.f32 0.6931472, %v2124_v0 }
 0x554   : > { %v1462_v40 = vsub.f32 %v2757_v19, %v1442_v38 }
 0x555   : > { %v2126_v41 = vpop.eup %2125  ;;  %v1461_v42 = vsub.f32 %v2754_v15, %v1440_v39 }
 0x556   : > { %v2128_v12 = vpop.eup %2127  ;;  %1479 = vst.msk [vmem:[%s2782_s30 + $0x58] sm:$0xff] %vm1467_vm2, %v1462_v40  ;;  %v1446_v7 = vmul.f32 0.6931472, %v2126_v41 }
 0x557   : > { %1478 = vst.msk [vmem:[%s2782_s30 + $0x50] sm:$0xff] %vm1467_vm2, %v1461_v42  ;;  %v1444_v43 = vmul.f32 0.6931472, %v2128_v12 }
 0x558   : > { %v1464_v44 = vsub.f32 %v2765_v27, %v1446_v7 }
 0x559   : > { %v2130_v45 = vpop.eup %2129  ;;  %v1463_v46 = vsub.f32 %v2761_v22, %v1444_v43 }
 0x55a   : > { %v2132_v48 = vpop.eup %2131  ;;  %1481 = vst.msk [vmem:[%s2782_s30 + $0x68] sm:$0xff] %vm1467_vm2, %v1464_v44  ;;  %v1450_v19 = vmul.f32 0.6931472, %v2130_v45 }
 0x55b   : > { %1480 = vst.msk [vmem:[%s2782_s30 + $0x60] sm:$0xff] %vm1467_vm2, %v1463_v46  ;;  %v1448_v15 = vmul.f32 0.6931472, %v2132_v48 }
 0x55c   : > { %v1466_v49 = vsub.f32 %v2773_v35, %v1450_v19 }
 0x55d   : > { %v1465_v50 = vsub.f32 %v2769_v30, %v1448_v15 }
 0x55e   : > { %1483 = vst.msk [vmem:[%s2782_s30 + $0x78] sm:$0xff] %vm1467_vm2, %v1466_v49 }
 0x55f   : > { %1482 = vst.msk [vmem:[%s2782_s30 + $0x70] sm:$0xff] %vm1467_vm2, %v1465_v50 }
 0x560 PF: > { %p21_p11 = scmp.ge.s32.totalorder %s2530_s29, 4   ;;  %s2872_s30 = smov %s2309_s10 }
 0x561   : > { %s2873_s10 = smov %s2313_s11  ;;  %s2874_s11 = smov %s2541_s27 }
 0x562   : > { %s2875_s12 = smov %s2530_s29  ;;  %23 = sbr.rel (!%p21_p11) target bundleno = 7 (0x7), region = 112 }
 0x569   :  { %1506 = vsyncpa [#allocation3], 1 }
 0x56a   :  { %1508 = vsyncpa [#allocation3 + $0x1], 1 }
 0x56b   :  { %1509 = vsyncpa [#allocation5], 1 }
 0x56c   :  { %1510 = vsyncpa [#allocation8], 1 }

</bundles_post_ra>
